<compile_context>
chip_gen: v7x
topology: tpu7x:2x2x1
jax: 0.10.0
libtpu: 0.0.40
codegen_flags: <defaults>
</compile_context>

<pallas_src>
import math

import jax
import jax.numpy as jnp
import numpy as np
from jax.experimental import pallas as pl
from jax.experimental.pallas import tpu as pltpu

# ---- configuration (small, consistent with the latent-space module) --------
B = 2              # batch
L = 8              # latent sequence length (rows the MLP is applied to)
D_NEW = 32         # d_new (latent channel dim)
FF_HIDDEN = 64     # ff_latent_hidden
F_PAD = 128        # hidden dim zero-padded to a full 128-lane vreg / MXU pass
INV_SQRT2 = 1.0 / math.sqrt(2.0)


def latent_mlp_kernel(x_ref, wfc_ref, bfc_ref, wproj_ref, bproj_ref, out_ref):
    """x: (M, D); wfc: (D, Fp); bfc: (1, Fp); wproj: (Fp, D); bproj: (1, D)."""
    x = x_ref[...]                                    # (M, D) f32, M = B*L

    # c_fc: (M, D) @ (D, Fp) -> (M, Fp), lane-dense since Fp = 128
    h = jnp.dot(x, wfc_ref[...], preferred_element_type=jnp.float32) + bfc_ref[...]
    # exact GELU (torch nn.GELU default): 0.5 * x * (1 + erf(x / sqrt(2)))
    h = 0.5 * h * (1.0 + jax.lax.erf(h * INV_SQRT2))
    # c_proj: (M, Fp) @ (Fp, D) -> (M, D); padded w_proj rows are zero
    y = jnp.dot(h, wproj_ref[...], preferred_element_type=jnp.float32) + bproj_ref[...]

    out_ref[...] = y
    # TODO(synk): nn.Dropout is identity in eval mode and is therefore omitted.


def latent_mlp_pallas(x, params):
    """x: (B, L, D_NEW) f32; params: dict (see init_params). Returns (B, L, D)."""
    Bb, Ll, D = x.shape
    F = params["w_fc"].shape[1]
    M = Bb * Ll

    # Flatten batch*seq into the sublane (row) dimension -> single invocation,
    # single DMA per operand, fatter M for both matmuls.
    x2d = x.reshape(M, D)

    # Zero-pad the hidden dim F -> F_PAD (128). gelu(0) = 0 and the padded
    # w_proj rows are zero, so results are bit-identical while the hidden
    # activation / matmul operands become lane-dense.
    f_pad = max(F_PAD, F)
    pad = f_pad - F
    w_fc = jnp.pad(params["w_fc"], ((0, 0), (0, pad)))          # (D, Fp)
    b_fc = jnp.pad(params["b_fc"], (0, pad)).reshape(1, f_pad)  # (1, Fp)
    w_proj = jnp.pad(params["w_proj"], ((0, pad), (0, 0)))      # (Fp, D)
    b_proj = params["b_proj"].reshape(1, D)                     # (1, D)

    flops = 2 * M * (D * f_pad + f_pad * D)
    bytes_accessed = 4 * (x2d.size + w_fc.size + b_fc.size
                          + w_proj.size + b_proj.size + M * D)

    out2d = pl.pallas_call(
        latent_mlp_kernel,
        out_shape=jax.ShapeDtypeStruct((M, D), x.dtype),
        # No grid: every operand is one whole VMEM-resident block (~40 KiB
        # total), so there is no pipeline machinery at all.
        in_specs=[pl.BlockSpec(memory_space=pltpu.MemorySpace.VMEM)] * 5,
        out_specs=pl.BlockSpec(memory_space=pltpu.MemorySpace.VMEM),
        cost_estimate=pl.CostEstimate(
            flops=flops,
            transcendentals=M * f_pad,
            bytes_accessed=bytes_accessed,
        ),
    )(x2d, w_fc, b_fc, w_proj, b_proj)

    return out2d.reshape(Bb, Ll, D)


# ---------------- pure-JAX reference (correctness check) --------------------
def latent_mlp_ref(x, p):
    h = x @ p["w_fc"] + p["b_fc"]
    h = 0.5 * h * (1.0 + jax.lax.erf(h * INV_SQRT2))
    return h @ p["w_proj"] + p["b_proj"]


def init_params(key):
    # PyTorch nn.Linear stores (out, in); here weights are stored as (in, out)
    # so the kernel computes x @ W + b directly (same math).
    ks = jax.random.split(key, 4)
    s = 0.02
    return {
        "w_fc": s * jax.random.normal(ks[0], (D_NEW, FF_HIDDEN), jnp.float32),
        "b_fc": s * jax.random.normal(ks[1], (FF_HIDDEN,), jnp.float32),
        "w_proj": s * jax.random.normal(ks[2], (FF_HIDDEN, D_NEW), jnp.float32),
        "b_proj": s * jax.random.normal(ks[3], (D_NEW,), jnp.float32),
    }


if __name__ == "__main__":
    key = jax.random.PRNGKey(0)
    k_x, k_p = jax.random.split(key)
    x = jax.random.normal(k_x, (B, L, D_NEW), jnp.float32)
    params = init_params(k_p)

    out = latent_mlp_pallas(x, params)
    out = jax.block_until_ready(out)

    ref = jax.block_until_ready(latent_mlp_ref(x, params))
    np.testing.assert_allclose(np.asarray(out), np.asarray(ref),
                               rtol=1e-5, atol=1e-5)
    print("KERNEL_OK")
</pallas_src>

<mosaic_0001>
module attributes {stable_mosaic.version = 11 : i64} {
  func.func @latent_mlp_kernel(%arg0: memref<16x32xf32, #tpu.memory_space<vmem>>, %arg1: memref<32x128xf32, #tpu.memory_space<vmem>>, %arg2: memref<1x128xf32, #tpu.memory_space<vmem>>, %arg3: memref<128x32xf32, #tpu.memory_space<vmem>>, %arg4: memref<1x32xf32, #tpu.memory_space<vmem>>, %arg5: memref<16x32xf32, #tpu.memory_space<vmem>>) attributes {dimension_semantics = [], scalar_prefetch = 0 : i64, scratch_operands = 0 : i64, tpu.core_type = #tpu.core_type<tc>} {
    %c0 = arith.constant 0 : index
    %c0_0 = arith.constant 0 : index
    %0 = vector.load %arg0[%c0, %c0_0] : memref<16x32xf32, #tpu.memory_space<vmem>>, vector<16x32xf32>
    %c0_1 = arith.constant 0 : index
    %c0_2 = arith.constant 0 : index
    %1 = vector.load %arg1[%c0_1, %c0_2] : memref<32x128xf32, #tpu.memory_space<vmem>>, vector<32x128xf32>
    %cst = arith.constant dense<0.000000e+00> : vector<16x128xf32>
    %2 = tpu.matmul %0, %1, %cst {dimension_numbers = #tpu.dot_dimension_numbers<[1], [0], [0], [1], [0, 0, 1, 1], [], []>} : vector<16x32xf32>, vector<32x128xf32>, vector<16x128xf32> -> vector<16x128xf32>
    %c0_3 = arith.constant 0 : index
    %c0_4 = arith.constant 0 : index
    %3 = vector.load %arg2[%c0_3, %c0_4] : memref<1x128xf32, #tpu.memory_space<vmem>>, vector<1x128xf32>
    %4 = vector.broadcast %3 : vector<1x128xf32> to vector<16x128xf32>
    %5 = arith.addf %2, %4 : vector<16x128xf32>
    %cst_5 = arith.constant 5.000000e-01 : f32
    %6 = vector.broadcast %cst_5 : f32 to vector<16x128xf32>
    %7 = arith.mulf %6, %5 : vector<16x128xf32>
    %cst_6 = arith.constant 0.707106769 : f32
    %8 = vector.broadcast %cst_6 : f32 to vector<16x128xf32>
    %9 = arith.mulf %5, %8 : vector<16x128xf32>
    %10 = math.erf %9 : vector<16x128xf32>
    %cst_7 = arith.constant 1.000000e+00 : f32
    %11 = vector.broadcast %cst_7 : f32 to vector<16x128xf32>
    %12 = arith.addf %11, %10 : vector<16x128xf32>
    %13 = arith.mulf %7, %12 : vector<16x128xf32>
    %c0_8 = arith.constant 0 : index
    %c0_9 = arith.constant 0 : index
    %14 = vector.load %arg3[%c0_8, %c0_9] : memref<128x32xf32, #tpu.memory_space<vmem>>, vector<128x32xf32>
    %cst_10 = arith.constant dense<0.000000e+00> : vector<16x32xf32>
    %15 = tpu.matmul %13, %14, %cst_10 {dimension_numbers = #tpu.dot_dimension_numbers<[1], [0], [0], [1], [0, 0, 1, 1], [], []>} : vector<16x128xf32>, vector<128x32xf32>, vector<16x32xf32> -> vector<16x32xf32>
    %c0_11 = arith.constant 0 : index
    %c0_12 = arith.constant 0 : index
    %16 = vector.load %arg4[%c0_11, %c0_12] : memref<1x32xf32, #tpu.memory_space<vmem>>, vector<1x32xf32>
    %17 = vector.broadcast %16 : vector<1x32xf32> to vector<16x32xf32>
    %18 = arith.addf %15, %17 : vector<16x32xf32>
    %c0_13 = arith.constant 0 : index
    %c0_14 = arith.constant 0 : index
    %19 = vector.load %arg5[%c0_13, %c0_14] : memref<16x32xf32, #tpu.memory_space<vmem>>, vector<16x32xf32>
    tpu.vector_store %arg5[%c0_13, %c0_14], %18 {strides = array<i32>} : memref<16x32xf32, #tpu.memory_space<vmem>>, vector<16x32xf32>,
    return
  }
}

</mosaic_0001>

<bundles_post_ra>
// kernel: tpu_custom_call.1
= control target key start
LH: loop header
LB: loop body
LE: loop exit
PB: predicated region body
PF: predicated region fallthrough
CT: control target
= control target key end

     0   :  { %vm34_vm0 = vcmask 261120   ;;  %s508_s0 = inlined_call_operand.vmem [shape: f32[16,32], index: 0, kind: input, shape index: {}]   ;;  %s509_s1 = inlined_call_operand.vmem [shape: f32[32,128], index: 1, kind: input, shape index: {}]   ;;  %s510_s2 = inlined_call_operand.vmem [shape: f32[1,128], index: 2, kind: input, shape index: {}]   ;;  %s511_s3 = inlined_call_operand.vmem [shape: f32[128,32], index: 3, kind: input, shape index: {}]   ;;  %s512_s4 = inlined_call_operand.vmem [shape: f32[1,32], index: 4, kind: input, shape index: {}]   ;;  %s513_s5 = inlined_call_operand.hbm [shape: f32[16,32], index: 5, kind: output, shape index: {}]  }
   0x1   :  { %v23_v0 = vld [vmem:[%s509_s1] sm:$0xff]  ;;  %v24_v1 = vld [vmem:[%s509_s1 + $0x8] sm:$0xff]  ;;  %v25_v2 = vld [vmem:[%s509_s1 + $0x10] sm:$0xff] }
   0x2   :  { %v316_v3 = vpack.c.bf16 %v24_v1, %v23_v0  ;;  %v26_v4 = vld [vmem:[%s509_s1 + $0x18] sm:$0xff]  ;;  %v21_v5 = vld [vmem:[%s508_s0] sm:$0xff]  ;;  %v127_v8 = vld [vmem:[%s511_s3 + $0x8] sm:$0xff] }
   0x3   :  { %v320_v6 = vpack.c.bf16 %v26_v4, %v25_v2  ;;  %278 = vmatprep.mubr.msk.f32.mxu0 %vm34_vm0, %v21_v5  ;;  %v126_v7 = vld [vmem:[%s511_s3] sm:$0xff]  ;;  %v128_v9 = vld [vmem:[%s511_s3 + $0x10] sm:$0xff]  ;;  %v129_v11 = vld [vmem:[%s511_s3 + $0x18] sm:$0xff] }
   0x4   :  { %317 = vmatprep.subr.bf16.mxu0 %v316_v3  ;;  %v324_v10 = vpack.c.bf16 %v127_v8, %v126_v7  ;;  %v328_v12 = vpack.c.bf16 %v129_v11, %v128_v9  ;;  %v130_v13 = vld [vmem:[%s511_s3 + $0x20] sm:$0xff]  ;;  %v131_v14 = vld [vmem:[%s511_s3 + $0x28] sm:$0xff] }
   0x5   :  { %319 = vmatpush3.bf16.msra.mxu0 %v316_v3 }
   0x6   :  { %10 = vsyncpa [#allocation3], 0  ;;  %321 = vmatprep.subr.bf16.mxu0 %v320_v6  ;;  %325 = vmatprep.subr.bf16.mxu1 %v324_v10  ;;  %v332_v15 = vpack.c.bf16 %v131_v14, %v130_v13  ;;  %v22_v16 = vld [vmem:[%s508_s0 + $0x8] sm:$0xff]  ;;  %v132_v17 = vld [vmem:[%s511_s3 + $0x30] sm:$0xff]  ;;  %s387_s11 = smov [#allocation2]  }
   0x7   :  { %327 = vmatpush3.bf16.msra.mxu1 %v324_v10  ;;  %v133_v18 = vld [vmem:[%s511_s3 + $0x38] sm:$0xff]  ;;  %v134_v20 = vld [vmem:[%s511_s3 + $0x40] sm:$0xff]  ;;  %v135_v21 = vld [vmem:[%s511_s3 + $0x48] sm:$0xff]  ;;  %s231_s12 = sshll.u32 %s387_s11, 4  ;;  %s232_s12 = int_to_ptr.vmem [resolvable:$true] %s231_s12 }
   0x8   :  { %329 = vmatprep.subr.bf16.mxu1 %v328_v12  ;;  %v336_v19 = vpack.c.bf16 %v133_v18, %v132_v17  ;;  %v340_v22 = vpack.c.bf16 %v135_v21, %v134_v20  ;;  %v136_v23 = vld [vmem:[%s511_s3 + $0x50] sm:$0xff]  ;;  %v137_v24 = vld [vmem:[%s511_s3 + $0x58] sm:$0xff]  ;;  %v138_v26 = vld [vmem:[%s511_s3 + $0x60] sm:$0xff]  ;;  %s363_s13 = scalar_lea.vmem %s232_s12, 256  ;;  %p368_p1 = scmp.lt.s32.totalorder %s232_s12, %s232_s12 }
   0x9   :  { %323 = vmatpush3.bf16.msra.mxu0 %v320_v6  ;;  %v344_v25 = vpack.c.bf16 %v137_v24, %v136_v23  ;;  %v139_v27 = vld [vmem:[%s511_s3 + $0x68] sm:$0xff]  ;;  %v140_v29 = vld [vmem:[%s511_s3 + $0x70] sm:$0xff]  ;;  %v141_v30 = vld [vmem:[%s511_s3 + $0x78] sm:$0xff]  ;;  %p364_p0 = scmp.ne.s32.totalorder %s232_s12, %s363_s13  ;;  %p369_p2 = scmp.lt.s32.totalorder %s363_s13, %s363_s13 }
   0xa   :  { %v348_v28 = vpack.c.bf16 %v139_v27, %v138_v26  ;;  %v352_v31 = vpack.c.bf16 %v141_v30, %v140_v29  ;;  %v242_v32 = vld [vmem:[%s510_s2] ss:$0 sm:$0xff] }
   0xb   :  { %331 = vmatpush3.bf16.msra.mxu1 %v328_v12  ;;  %v245_v47 = vld [vmem:[%s512_s4] ss:$0 sm:$0xff]  ;;  %p370_p3 = por %p369_p2, %p368_p1 }
   0xc   :  { %279 = vmatmul.mubr.msk.f32.vlgmr.msra.gmra.mrb[0].mxu0 %vm34_vm0, %v22_v16  ;;  %333 = vmatprep.subr.bf16.mxu1 %v332_v15 }
   0xd   :  { %p371_p4 = pnand %p370_p3, %p364_p0 }
   0xf   :  { %335 = vmatpush3.bf16.msra.mxu1 %v332_v15 }
  0x10   :  { %337 = vmatprep.subr.bf16.mxu1 %v336_v19 }
  0x13   :  { %339 = vmatpush3.bf16.msra.mxu1 %v336_v19 }
  0x14   :  { %341 = vmatprep.subr.bf16.mxu1 %v340_v22 }
  0x17   :  { %343 = vmatpush3.bf16.msra.mxu1 %v340_v22 }
  0x18   :  { %345 = vmatprep.subr.bf16.mxu1 %v344_v25 }
  0x1b   :  { %347 = vmatpush3.bf16.msra.mxu1 %v344_v25 }
  0x1c   :  { %349 = vmatprep.subr.bf16.mxu1 %v348_v28 }
  0x1f   :  { %351 = vmatpush3.bf16.msra.mxu1 %v348_v28 }
  0x20   :  { %353 = vmatprep.subr.bf16.mxu1 %v352_v31 }
  0x23   :  { %355 = vmatpush3.bf16.msra.mxu1 %v352_v31 }
  0xdf   :  { %v280_v33 = vpop.f32.mrb[0].mxu0 }
  0xe0   :  { %v113_v34 = vadd.f32 %v280_v33, %v242_v32  ;;  %v107_v35 = vpop.f32.mrb[1].mxu0 }
  0xe1   :  { %v108_v36 = vadd.f32 %v242_v32, %v107_v35 }
  0xe2   :  { %v119_v37 = vmul.f32 0.70710677, %v113_v34  ;;  %v117_v44 = vmul.f32 0.5, %v113_v34 }
  0xe3   :  { %v118_v38 = vmul.f32 0.70710677, %v108_v36  ;;  %v116_v42 = vmul.f32 0.5, %v108_v36 }
  0xe4   :  { %359 = verf.f32 %v119_v37 }
  0xe5   :  { %361 = verf.f32 %v118_v38 }
  0xee   :  { %v360_v39 = vpop.eup %359 }
  0xef   :  { %v362_v40 = vpop.eup %361  ;;  %v123_v41 = vadd.f32 1.0, %v360_v39 }
  0xf0   :  { %v122_v43 = vadd.f32 1.0, %v362_v40 }
  0xf1   :  { %v125_v46 = vmul.f32 %v123_v41, %v117_v44 }
  0xf2   :  { %v124_v45 = vmul.f32 %v122_v43, %v116_v42 }
  0xf4   :  { %313 = vmatprep.mubr.f32.mxu1 %v124_v45 }
  0xf5   :  { %314 = vmatmul.mubr.f32.vlgmr.msra.gmra.mrb[0].mxu1 %v125_v46 }
 0x1c8   :  { %v315_v48 = vpop.f32.mrb[0].mxu1 }
 0x1c9   :  { %v221_v49 = vadd.f32 %v315_v48, %v245_v47  ;;  %v215_v50 = vpop.f32.mrb[1].mxu1 }
 0x1ca   :  { %v216_v51 = vadd.f32 %v245_v47, %v215_v50 }
 0x1cb   :  { %225 = vst.msk [vmem:[#allocation2 + $0x8] sm:$0xff] %vm34_vm0, %v221_v49 }
 0x1cc   :  { %224 = vst.msk [vmem:[#allocation2] sm:$0xff] %vm34_vm0, %v216_v51 }
 0x1cd   :  { %374 = shalt.err (!%p371_p4)
}
 0x1ce   :  { %s375_s15 = scalar_lea.hbm %s513_s5, 256 }
 0x1cf   :  { %p376_p5 = scmp.ne.s32.totalorder %s513_s5, %s375_s15  ;;  %p379_p6 = scmp.lt.u32.totalorder %s375_s15, %s513_s5 }
 0x1d1   :  { %p381_p7 = pnand %p379_p6, %p376_p5 }
 0x1d3   :  { %384 = shalt.err (!%p381_p7)
}
 0x1d4   :  { %s388_s20 = smov 128   ;;  %s389_s21 = smov 8  }
 0x1d5   :  { %237 = dma.vmem_to_hbm [thread:$0]  %s232_s12, 256, %s513_s5, [#allocation3], %s388_s20, %s388_s20, %s389_s21  }
 0x1d6   :  { %385 = dma.done.wait [#allocation3], 256  }
 0x1d7   :  { %386 = vsyncadd [#allocation3], 4294967040 }
 0x1d8   :  { %241 = vsyncpa [#allocation3], 1 }

</bundles_post_ra>
